<compile_context>
chip_gen: v5e
topology: v5e:2x2
jax: 0.10.0
libtpu: 0.0.40
codegen_flags: <defaults>
</compile_context>

<pallas_src>
import jax
import jax.numpy as jnp
from jax.experimental import pallas as pl
from jax.experimental.pallas import tpu as pltpu


def _round_up(x: int, m: int) -> int:
    return ((x + m - 1) // m) * m


def _sublane_pack(dtype) -> int:
    # Sublane packing of the second-minor dim: 8 for 4-byte, 16 for 2-byte,
    # 32 for 1-byte dtypes.
    return max(8, 32 // jnp.dtype(dtype).itemsize)


def _device_defaults() -> dict:
    try:
        kind = jax.devices()[0].device_kind.lower()
    except Exception:  # pragma: no cover - defensive
        kind = ""
    if "v7" in kind:   # 64 MiB VMEM / TC, 2 TCs
        return dict(tm=1536, tn=1536, tk=512, vmem_cap=64 << 20)
    if "v6" in kind:   # 128 MiB VMEM
        return dict(tm=2048, tn=2048, tk=512, vmem_cap=128 << 20)
    if "v5" in kind:   # 128 MiB VMEM, lower ridge point
        return dict(tm=1024, tn=1024, tk=512, vmem_cap=128 << 20)
    return dict(tm=1024, tn=1024, tk=512, vmem_cap=64 << 20)


def _vmem_limit_bytes(tm, tn, tk, in_bytes, out_bytes, cap) -> int:
    est = (
        2 * tm * tk * in_bytes      # double-buffered x tiles
        + 2 * tk * tn * in_bytes    # double-buffered w tiles
        + 2 * tm * tn * out_bytes   # double-buffered output tiles
        + tm * tn * 4               # f32 accumulator scratch
        + 2 * tn * 4                # bias tiles
    )
    est = int(est * 1.25) + (4 << 20)  # headroom for compiler scratch
    return min(cap, max(32 << 20, est))


# ---------------------------------------------------------------------------
# Kernels
# ---------------------------------------------------------------------------
def _matmul_kernel(x_ref, w_ref, o_ref, acc_ref):
    # x_ref: (tm, tk), w_ref: (tk, tn), o_ref: (tm, tn), acc_ref: (tm, tn) f32
    k = pl.program_id(2)

    @pl.when(k == 0)
    def _():
        acc_ref[...] = jnp.zeros_like(acc_ref)

    acc_ref[...] += jnp.dot(
        x_ref[...], w_ref[...], preferred_element_type=jnp.float32
    )

    @pl.when(k == pl.num_programs(2) - 1)
    def _():
        o_ref[...] = acc_ref[...].astype(o_ref.dtype)


def _matmul_bias_kernel(x_ref, w_ref, b_ref, o_ref, acc_ref):
    # Bias is folded into the accumulator init -> no epilogue add.
    # x_ref: (tm, tk), w_ref: (tk, tn), b_ref: (1, tn) f32, o_ref: (tm, tn)
    k = pl.program_id(2)

    @pl.when(k == 0)
    def _():
        acc_ref[...] = jnp.broadcast_to(
            b_ref[...].astype(jnp.float32), acc_ref.shape
        )

    acc_ref[...] += jnp.dot(
        x_ref[...], w_ref[...], preferred_element_type=jnp.float32
    )

    @pl.when(k == pl.num_programs(2) - 1)
    def _():
        o_ref[...] = acc_ref[...].astype(o_ref.dtype)


# ---------------------------------------------------------------------------
# Module-style wrapper: weight prep happens ONCE at construction.
# ---------------------------------------------------------------------------
class RowParallelLinearPallas:
    """y = x @ weight.T + bias  (tp_size == 1).

    The frozen parameter is cast / transposed / lane-padded once here; call
    the instance repeatedly without re-paying those HBM passes.
    Pass dtype=jnp.bfloat16 (and bf16 activations) for MXU-peak production use.
    """

    def __init__(self, weight, bias=None, *, dtype=None, tm=None, tn=None, tk=None):
        defaults = _device_defaults()
        weight = jnp.asarray(weight)
        self.dtype = jnp.dtype(dtype) if dtype is not None else weight.dtype

        N, K = weight.shape
        self.output_size = N
        self.input_size = K

        self.tm = int(tm) if tm is not None else defaults["tm"]
        tn = int(tn) if tn is not None else defaults["tn"]
        tk = int(tk) if tk is not None else defaults["tk"]
        self.vmem_cap = defaults["vmem_cap"]

        # Clamp the N / K tiles to the (aligned) problem; keep lane-dense.
        self.tn = min(tn, _round_up(N, 128))
        self.tk = min(tk, _round_up(K, 128))
        self.Np = _round_up(N, self.tn)
        self.Kp = _round_up(K, self.tk)

        # One-time cast + transpose (+ zero-pad) of the frozen parameter so the
        # kernel's RHS tile is (tk, tn) and feeds the MXU with no per-tile
        # transpose. (Casting to a narrower dtype than the stored weight
        # changes numerics vs. PyTorch F.linear with an f32 weight.)
        w_t = weight.astype(self.dtype).T  # (K, N)
        if (self.Kp, self.Np) != (K, N):
            w_t = jnp.pad(w_t, ((0, self.Kp - K), (0, self.Np - N)))
        self.w_t = w_t

        if bias is not None:
            b2 = jnp.asarray(bias).astype(jnp.float32).reshape(1, N)
            if self.Np != N:
                b2 = jnp.pad(b2, ((0, 0), (0, self.Np - N)))
            self.b2 = b2
        else:
            self.b2 = None

        # TODO(synk): tp_size > 1 path (sharded K + cross-device all-reduce via
        # make_async_remote_copy) not implemented; module under test has tp_size == 1.

    def __call__(self, x):
        *lead, K = x.shape
        assert K == self.input_size, f"input_size mismatch: {K} vs {self.input_size}"
        x2 = x.reshape(-1, K)
        if x2.dtype != self.dtype:
            x2 = x2.astype(self.dtype)
        M = x2.shape[0]

        pack = _sublane_pack(self.dtype)
        tm = min(self.tm, _round_up(M, pack))
        Mp = _round_up(M, tm)

        # Zero-pad M / K only when needed (K padding contributes 0 to the
        # contraction; M padding is sliced off after the call).
        if (Mp, self.Kp) != (M, K):
            x2 = jnp.pad(x2, ((0, Mp - M), (0, self.Kp - K)))

        # Megacore: if the M axis collapses to one block, split N so a
        # "parallel" grid axis still has >= 2 blocks (v7x has 2 TCs/chip).
        tn = self.tn
        while Mp // tm == 1 and self.Np // tn < 2 and tn > 256 and tn % 256 == 0:
            tn //= 2

        grid = (Mp // tm, self.Np // tn, self.Kp // self.tk)

        x_spec = pl.BlockSpec((tm, self.tk), lambda i, j, k: (i, k))
        w_spec = pl.BlockSpec((self.tk, tn), lambda i, j, k: (k, j))
        o_spec = pl.BlockSpec((tm, tn), lambda i, j, k: (i, j))
        scratch = [pltpu.VMEM((tm, tn), jnp.float32)]

        itemsize = jnp.dtype(self.dtype).itemsize
        cparams = pltpu.CompilerParams(
            dimension_semantics=("parallel", "parallel", "arbitrary"),
            vmem_limit_bytes=_vmem_limit_bytes(
                tm, tn, self.tk, itemsize, itemsize, self.vmem_cap
            ),
        )
        out_shape = jax.ShapeDtypeStruct((Mp, self.Np), self.dtype)

        if self.b2 is None:
            out = pl.pallas_call(
                _matmul_kernel,
                out_shape=out_shape,
                grid_spec=pltpu.PrefetchScalarGridSpec(
                    num_scalar_prefetch=0,
                    grid=grid,
                    in_specs=[x_spec, w_spec],
                    out_specs=o_spec,
                    scratch_shapes=scratch,
                ),
                compiler_params=cparams,
            )(x2, self.w_t)
        else:
            b_spec = pl.BlockSpec((1, tn), lambda i, j, k: (0, j))
            out = pl.pallas_call(
                _matmul_bias_kernel,
                out_shape=out_shape,
                grid_spec=pltpu.PrefetchScalarGridSpec(
                    num_scalar_prefetch=0,
                    grid=grid,
                    in_specs=[x_spec, w_spec, b_spec],
                    out_specs=o_spec,
                    scratch_shapes=scratch,
                ),
                compiler_params=cparams,
            )(x2, self.w_t, self.b2)

        if (Mp, self.Np) != (M, self.output_size):
            out = out[:M, : self.output_size]
        return out.reshape(*lead, self.output_size)


def row_parallel_linear(x, weight, bias=None, **kwargs):
    """One-shot functional form. NOTE: this re-does the one-time weight prep;
    for repeated calls construct RowParallelLinearPallas once and reuse it."""
    return RowParallelLinearPallas(weight, bias, **kwargs)(x)


if __name__ == "__main__":
    key = jax.random.PRNGKey(0)
    kx, kw, kb, kx2, kw2 = jax.random.split(key, 5)

    # ---- Test 1: module-implied small shapes, bias path, hoisted weight prep.
    batch, seq, input_size, output_size = 2, 8, 32, 64
    x = jax.random.normal(kx, (batch, seq, input_size), dtype=jnp.float32)
    weight = jax.random.normal(kw, (output_size, input_size), dtype=jnp.float32) * 0.02
    bias = jax.random.normal(kb, (output_size,), dtype=jnp.float32) * 0.01

    layer = RowParallelLinearPallas(weight, bias)  # weight prep happens once here
    y = jax.block_until_ready(layer(x))
    y_ref = jnp.einsum("bsk,nk->bsn", x, weight) + bias
    assert y.shape == (batch, seq, output_size)
    assert jnp.allclose(y, y_ref, atol=1e-5, rtol=1e-5)

    # ---- Test 2: default bias=False path, small tile overrides so the full
    # 3-D (M, N, K) grid + K accumulation is exercised (grid = (2, 2, 2)).
    M2, K2, N2 = 32, 256, 256
    x2 = jax.random.normal(kx2, (M2, K2), dtype=jnp.float32)
    w2 = jax.random.normal(kw2, (N2, K2), dtype=jnp.float32) * 0.02
    y2 = jax.block_until_ready(
        row_parallel_linear(x2, w2, None, tm=16, tn=128, tk=128)
    )
    y2_ref = x2 @ w2.T
    assert y2.shape == (M2, N2)
    assert jnp.allclose(y2, y2_ref, atol=1e-4, rtol=1e-4)

    # ---- Test 3: production bf16 path (bf16 MXU operands, f32 accumulation).
    layer_bf16 = RowParallelLinearPallas(weight, bias, dtype=jnp.bfloat16)
    yb = jax.block_until_ready(layer_bf16(x.astype(jnp.bfloat16)))
    yb_ref = (
        jnp.einsum(
            "bsk,nk->bsn",
            x.astype(jnp.bfloat16).astype(jnp.float32),
            weight.astype(jnp.bfloat16).astype(jnp.float32),
        )
        + bias
    )
    assert yb.shape == (batch, seq, output_size)
    assert jnp.allclose(
        yb.astype(jnp.float32), yb_ref, atol=5e-2, rtol=5e-2
    )

    print("KERNEL_OK")
</pallas_src>

<mosaic_0001>
module attributes {stable_mosaic.version = 11 : i64} {
  func.func @_matmul_bias_kernel(%arg0: i32, %arg1: i32, %arg2: i32, %arg3: memref<16x128xf32, #tpu.memory_space<vmem>>, %arg4: memref<128x128xf32, #tpu.memory_space<vmem>>, %arg5: memref<1x128xf32, #tpu.memory_space<vmem>>, %arg6: memref<16x128xf32, #tpu.memory_space<vmem>>, %arg7: memref<16x128xf32, #tpu.memory_space<vmem>>) attributes {dimension_semantics = [#tpu.dimension_semantics<parallel>, #tpu.dimension_semantics<parallel>, #tpu.dimension_semantics<arbitrary>], iteration_bounds = array<i64: 1, 1, 1>, scalar_prefetch = 0 : i64, scratch_operands = 1 : i64, tpu.core_type = #tpu.core_type<tc>, window_params = [{transform_indices = @transform_0, window_bounds = array<i64: 16, 128>}, {transform_indices = @transform_1, window_bounds = array<i64: 128, 128>}, {transform_indices = @transform_2, window_bounds = array<i64: 1, 128>}, {transform_indices = @transform_3, window_bounds = array<i64: 16, 128>}]} {
    %c0_i32 = arith.constant 0 : i32
    %0 = arith.cmpi eq, %arg2, %c0_i32 : i32
    %1 = arith.extui %0 : i1 to i32
    %c0_i32_0 = arith.constant 0 : i32
    %2 = arith.cmpi ne, %1, %c0_i32_0 : i32
    scf.if %2 {
      %c0_10 = arith.constant 0 : index
      %c0_11 = arith.constant 0 : index
      %12 = vector.load %arg5[%c0_10, %c0_11] : memref<1x128xf32, #tpu.memory_space<vmem>>, vector<1x128xf32>
      %13 = vector.shape_cast %12 : vector<1x128xf32> to vector<1x128xf32>
      %14 = vector.broadcast %13 : vector<1x128xf32> to vector<16x128xf32>
      %c0_12 = arith.constant 0 : index
      %c0_13 = arith.constant 0 : index
      %15 = vector.load %arg7[%c0_12, %c0_13] : memref<16x128xf32, #tpu.memory_space<vmem>>, vector<16x128xf32>
      tpu.vector_store %arg7[%c0_12, %c0_13], %14 {strides = array<i32>} : memref<16x128xf32, #tpu.memory_space<vmem>>, vector<16x128xf32>,
    } else {
    }
    %c0 = arith.constant 0 : index
    %c0_1 = arith.constant 0 : index
    %3 = vector.load %arg7[%c0, %c0_1] : memref<16x128xf32, #tpu.memory_space<vmem>>, vector<16x128xf32>
    %c0_2 = arith.constant 0 : index
    %c0_3 = arith.constant 0 : index
    %4 = vector.load %arg3[%c0_2, %c0_3] : memref<16x128xf32, #tpu.memory_space<vmem>>, vector<16x128xf32>
    %c0_4 = arith.constant 0 : index
    %c0_5 = arith.constant 0 : index
    %5 = vector.load %arg4[%c0_4, %c0_5] : memref<128x128xf32, #tpu.memory_space<vmem>>, vector<128x128xf32>
    %cst = arith.constant dense<0.000000e+00> : vector<16x128xf32>
    %6 = tpu.matmul %4, %5, %cst {dimension_numbers = #tpu.dot_dimension_numbers<[1], [0], [0], [1], [0, 0, 1, 1], [], []>} : vector<16x128xf32>, vector<128x128xf32>, vector<16x128xf32> -> vector<16x128xf32>
    %7 = arith.addf %3, %6 : vector<16x128xf32>
    %c0_6 = arith.constant 0 : index
    %c0_7 = arith.constant 0 : index
    %8 = vector.load %arg7[%c0_6, %c0_7] : memref<16x128xf32, #tpu.memory_space<vmem>>, vector<16x128xf32>
    tpu.vector_store %arg7[%c0_6, %c0_7], %7 {strides = array<i32>} : memref<16x128xf32, #tpu.memory_space<vmem>>, vector<16x128xf32>,
    %c0_i32_8 = arith.constant 0 : i32
    %9 = arith.cmpi eq, %arg2, %c0_i32_8 : i32
    %10 = arith.extui %9 : i1 to i32
    %c0_i32_9 = arith.constant 0 : i32
    %11 = arith.cmpi ne, %10, %c0_i32_9 : i32
    scf.if %11 {
      %c0_10 = arith.constant 0 : index
      %c0_11 = arith.constant 0 : index
      %12 = vector.load %arg7[%c0_10, %c0_11] : memref<16x128xf32, #tpu.memory_space<vmem>>, vector<16x128xf32>
      %c0_12 = arith.constant 0 : index
      %c0_13 = arith.constant 0 : index
      %13 = vector.load %arg6[%c0_12, %c0_13] : memref<16x128xf32, #tpu.memory_space<vmem>>, vector<16x128xf32>
      tpu.vector_store %arg6[%c0_12, %c0_13], %12 {strides = array<i32>} : memref<16x128xf32, #tpu.memory_space<vmem>>, vector<16x128xf32>,
    } else {
    }
    return
  }
  func.func @transform_0(%arg0: i32, %arg1: i32, %arg2: i32) -> (i32, i32) {
    %c0_i32 = arith.constant 0 : i32
    return %arg0, %arg2 : i32, i32
  }
  func.func @transform_1(%arg0: i32, %arg1: i32, %arg2: i32) -> (i32, i32) {
    %c0_i32 = arith.constant 0 : i32
    return %arg2, %arg1 : i32, i32
  }
  func.func @transform_2(%arg0: i32, %arg1: i32, %arg2: i32) -> (i32, i32) {
    %c0_i32 = arith.constant 0 : i32
    %c0_i32_0 = arith.constant 0 : i32
    return %c0_i32, %arg1 : i32, i32
  }
  func.func @transform_3(%arg0: i32, %arg1: i32, %arg2: i32) -> (i32, i32) {
    %c0_i32 = arith.constant 0 : i32
    return %arg0, %arg1 : i32, i32
  }
}

</mosaic_0001>

<bundles_post_ra>
// kernel: tpu_custom_call.1
= control target key start
LH: loop header
LB: loop body
LE: loop exit
PB: predicated region body
PF: predicated region fallthrough
CT: control target
= control target key end

     0   :  { %8 = vsyncpa [#allocation4], 0  ;;  %s277_s0 = inlined_call_operand.hbm [shape: f32[16,128], index: 0, kind: input, shape index: {}]   ;;  %s278_s1 = inlined_call_operand.hbm [shape: f32[128,128], index: 1, kind: input, shape index: {}]   ;;  %s279_s2 = inlined_call_operand.vmem [shape: f32[1,128], index: 2, kind: input, shape index: {}]   ;;  %s280_s3 = inlined_call_operand.hbm [shape: f32[16,128], index: 3, kind: output, shape index: {}]  }
   0x1   :  { %9 = vsyncpa [#allocation7], 0 }
   0x2   :  { %10 = vsyncpa [#allocation5], 0  ;;  %s15_s14 = sshll.u32 %s277_s0, 4  ;;  %s231_s15 = smov [#allocation3]   ;;  %s16_s14 = int_to_ptr.hbm [resolvable:$true] %s15_s14 }
   0x3   :  { %s17_s16 = sshll.u32 %s231_s15, 4  ;;  %s28_s19 = sshll.u32 %s278_s1, 4  ;;  %s18_s16 = int_to_ptr.vmem [resolvable:$true] %s17_s16  ;;  %s29_s19 = int_to_ptr.hbm [resolvable:$true] %s28_s19 }
   0x4   :  { %s232_s20 = smov 128   ;;  %s233_s21 = smov 8  }
   0x5   :  { %23 = dma.hbm_to_vmem [thread:$0]  %s16_s14, 256, %s18_s16, [#allocation4], %s232_s20, %s232_s20, %s233_s21  }
   0x6   :  { %s234_s22 = smov [#allocation6]  }
   0x7   :  { %s30_s23 = sshll.u32 %s234_s22, 4  ;;  %s31_s23 = int_to_ptr.vmem [resolvable:$true] %s30_s23 }
   0x8   :  { %36 = dma.hbm_to_vmem [thread:$0]  %s29_s19, 2048, %s31_s23, [#allocation7], %s232_s20, %s232_s20, %s233_s21  }
   0x9   :  { %225 = dma.done.wait [#allocation4], 256  }
   0xa   :  { %226 = vsyncadd [#allocation4], 4294967040 }
   0xb   :  { %227 = dma.done.wait [#allocation7], 2048  }
   0xc   :  { %228 = vsyncadd [#allocation7], 4294965248  ;;  %v76_v0 = vld [vmem:[#allocation6 + $0x78] sm:$0xff]  ;;  %v75_v1 = vld [vmem:[#allocation6 + $0x70] sm:$0xff]  ;;  %s235_s24 = smov [#allocation8]   ;;  %s117_s28 = sshll.u32 %s280_s3, 4  ;;  %s118_s28 = int_to_ptr.hbm [resolvable:$true] %s117_s28 }
   0xd   :  { %77 = vmatpush.msra.mxu0 %v76_v0  ;;  %131 = vmatpush.msra.mxu1 %v76_v0  ;;  %v74_v2 = vld [vmem:[#allocation6 + $0x68] sm:$0xff]  ;;  %v73_v3 = vld [vmem:[#allocation6 + $0x60] sm:$0xff]  ;;  %v72_v4 = vld [vmem:[#allocation6 + $0x58] sm:$0xff]  ;;  %s115_s25 = sshll.u32 %s235_s24, 4  ;;  %s116_s25 = int_to_ptr.vmem [resolvable:$true] %s115_s25 }
   0xe   :  { %v71_v5 = vld [vmem:[#allocation6 + $0x50] sm:$0xff]  ;;  %v70_v6 = vld [vmem:[#allocation6 + $0x48] sm:$0xff]  ;;  %v69_v7 = vld [vmem:[#allocation6 + $0x40] sm:$0xff] }
   0xf   :  { %78 = vmatpush.msra.mxu0 %v75_v1  ;;  %132 = vmatpush.msra.mxu1 %v75_v1  ;;  %v68_v8 = vld [vmem:[#allocation6 + $0x38] sm:$0xff]  ;;  %v67_v9 = vld [vmem:[#allocation6 + $0x30] sm:$0xff]  ;;  %v66_v10 = vld [vmem:[#allocation6 + $0x28] sm:$0xff] }
  0x10   :  { %v65_v11 = vld [vmem:[#allocation6 + $0x20] sm:$0xff]  ;;  %v64_v12 = vld [vmem:[#allocation6 + $0x18] sm:$0xff]  ;;  %v63_v13 = vld [vmem:[#allocation6 + $0x10] sm:$0xff] }
  0x11   :  { %79 = vmatpush.msra.mxu0 %v74_v2  ;;  %133 = vmatpush.msra.mxu1 %v74_v2  ;;  %v62_v14 = vld [vmem:[#allocation6 + $0x8] sm:$0xff]  ;;  %v61_v15 = vld [vmem:[#allocation6] sm:$0xff]  ;;  %v59_v16 = vld [vmem:[#allocation3] sm:$0xff] }
  0x12   :  { %v60_v17 = vld [vmem:[#allocation3 + $0x8] sm:$0xff]  ;;  %v152_v18 = vld [vmem:[%s279_s2] ss:$0 sm:$0xff] }
  0x13   :  { %80 = vmatpush.msra.mxu0 %v73_v3  ;;  %134 = vmatpush.msra.mxu1 %v73_v3 }
  0x15   :  { %81 = vmatpush.msra.mxu0 %v72_v4  ;;  %135 = vmatpush.msra.mxu1 %v72_v4 }
  0x17   :  { %82 = vmatpush.msra.mxu0 %v71_v5  ;;  %136 = vmatpush.msra.mxu1 %v71_v5 }
  0x19   :  { %83 = vmatpush.msra.mxu0 %v70_v6  ;;  %137 = vmatpush.msra.mxu1 %v70_v6 }
  0x1b   :  { %84 = vmatpush.msra.mxu0 %v69_v7  ;;  %138 = vmatpush.msra.mxu1 %v69_v7 }
  0x1d   :  { %85 = vmatpush.msra.mxu0 %v68_v8  ;;  %139 = vmatpush.msra.mxu1 %v68_v8 }
  0x1f   :  { %86 = vmatpush.msra.mxu0 %v67_v9  ;;  %140 = vmatpush.msra.mxu1 %v67_v9 }
  0x21   :  { %87 = vmatpush.msra.mxu0 %v66_v10  ;;  %141 = vmatpush.msra.mxu1 %v66_v10 }
  0x23   :  { %88 = vmatpush.msra.mxu0 %v65_v11  ;;  %142 = vmatpush.msra.mxu1 %v65_v11 }
  0x25   :  { %89 = vmatpush.msra.mxu0 %v64_v12  ;;  %143 = vmatpush.msra.mxu1 %v64_v12 }
  0x27   :  { %90 = vmatpush.msra.mxu0 %v63_v13  ;;  %144 = vmatpush.msra.mxu1 %v63_v13 }
  0x29   :  { %91 = vmatpush.msra.mxu0 %v62_v14  ;;  %145 = vmatpush.msra.mxu1 %v62_v14 }
  0x2b   :  { %92 = vmatpush.msra.mxu0 %v61_v15  ;;  %146 = vmatpush.msra.mxu1 %v61_v15 }
  0x2c   :  { %93 = vmatmul.f32.vlgmr.msra.gmra.mxu0 %v59_v16  ;;  %96 = vmatmul.f32.vlgmr.msra.gmra.mxu1 %v60_v17 }
  0xa9   :  { %v94_v19 = vpop.f32.mrf.mxu0  ;;  %v97_v20 = vpop.f32.mrf.mxu1 }
  0xaa   :  { %v100_v21 = vadd.f32 %v152_v18, %v94_v19  ;;  %v101_v22 = vadd.f32 %v152_v18, %v97_v20 }
  0xac   :  { %109 = vst [vmem:[#allocation8] sm:$0xff] %v100_v21 }
  0xad   :  { %110 = vst [vmem:[#allocation8 + $0x8] sm:$0xff] %v101_v22 }
  0xae   :  { %123 = dma.vmem_to_hbm [thread:$0]  %s116_s25, 256, %s118_s28, [#allocation5], %s232_s20, %s232_s20, %s233_s21  }
  0xaf   :  { %229 = dma.done.wait [#allocation5], 256  }
  0xb0   :  { %230 = vsyncadd [#allocation5], 4294967040 }
  0xb1   :  { %128 = vsyncpa [#allocation4], 1 }
  0xb2   :  { %129 = vsyncpa [#allocation7], 1 }
  0xb3   :  { %130 = vsyncpa [#allocation5], 1 }

</bundles_post_ra>
